<compile_context>
chip_gen: v6e
topology: v6e:2x2x1
jax: 0.10.0
libtpu: 0.0.40
codegen_flags: <defaults>
</compile_context>

<pallas_src>
import jax
import jax.numpy as jnp
from jax.experimental import pallas as pl
from jax.experimental.pallas import tpu as pltpu


def masked_generator_kernel(x_ref, w1_ref, b1_ref, w2_ref, b2_ref, mask_ref, o_ref):
    # Hidden layer: x @ W1 + b1, ReLU.  MXU matmul with f32 accumulation;
    # bias + ReLU on the VPU in f32 (v5e has no bf16 VALU).
    h = jnp.dot(x_ref[...], w1_ref[...], preferred_element_type=jnp.float32)
    h = jnp.maximum(h + b1_ref[...], 0.0)

    # Output layer: h @ W2 + b2, Tanh, then elementwise mask (exact for any mask).
    # jnp.tanh lowers to a single EUP op; the mask multiply rides the VPU slot.
    y = jnp.dot(h.astype(w2_ref.dtype), w2_ref[...], preferred_element_type=jnp.float32)
    o_ref[...] = (jnp.tanh(y + b2_ref[...]) * mask_ref[...]).astype(o_ref.dtype)


def prepare_params(w1, b1, w2, b2, mask, *, use_bf16=False):
    """One-time parameter prep (hoisted out of the forward path).

    w1: (H, D_in), w2: (D_out, H) in PyTorch Linear layout; b1: (H,), b2/mask: (D_out,).
    Returns matmul-layout weights, 2-D f32 biases/mask, optionally bf16 weights.
    """
    w1_t = jnp.asarray(w1).T                                   # (D_in, H)
    w2_t = jnp.asarray(w2).T                                   # (H, D_out)
    b1_row = jnp.asarray(b1).reshape(1, -1).astype(jnp.float32)
    b2_row = jnp.asarray(b2).reshape(1, -1).astype(jnp.float32)
    mask_row = jnp.asarray(mask).reshape(1, -1).astype(jnp.float32)
    if use_bf16:
        w1_t = w1_t.astype(jnp.bfloat16)
        w2_t = w2_t.astype(jnp.bfloat16)
    return w1_t, b1_row, w2_t, b2_row, mask_row


def masked_generator_forward(x, params, *, tile_b=2048, use_bf16=False):
    """Fused forward pass.  x: (B, D_in); params from prepare_params()."""
    w1_t, b1_row, w2_t, b2_row, mask_row = params
    B, D_in = x.shape
    H = w1_t.shape[1]
    D_out = w2_t.shape[1]

    if use_bf16:
        # bf16 matmul inputs: full MXU rate and half the dominant x DMA bytes.
        x = x.astype(jnp.bfloat16)
    out_dtype = jnp.bfloat16 if use_bf16 else jnp.float32      # tanh output fits bf16

    # --- batch tile choice ----------------------------------------------------
    # Large tiles amortize the ~0.35us per-grid-step pipeline overhead (kernel is
    # HBM-bound).  Clamp to the sublane-aligned batch so tiny batches stay tiny;
    # double-buffered footprint at tile_b=2048 f32 is ~1.9 MB, well under every
    # generation's default scoped VMEM limit, so no vmem_limit_bytes override.
    tile_b = max(8, (int(tile_b) // 8) * 8)
    b_ceil = pl.cdiv(B, 8) * 8
    tile_b = min(tile_b, b_ceil)
    # If a large batch would collapse to a single grid step, split it in two so
    # dimension_semantics=("parallel",) can shard across v7x's two TensorCores.
    if pl.cdiv(B, tile_b) < 2 and b_ceil >= 1024:
        tile_b = pl.cdiv(pl.cdiv(B, 2), 8) * 8

    grid = (pl.cdiv(B, tile_b),)   # ragged last block handled by Pallas (no jnp.pad)

    return pl.pallas_call(
        masked_generator_kernel,
        out_shape=jax.ShapeDtypeStruct((B, D_out), out_dtype),
        grid_spec=pltpu.PrefetchScalarGridSpec(
            num_scalar_prefetch=0,
            grid=grid,
            in_specs=[
                pl.BlockSpec((tile_b, D_in), lambda i: (i, 0)),   # x batch tile
                pl.BlockSpec((D_in, H), lambda i: (0, 0)),        # W1 (resident)
                pl.BlockSpec((1, H), lambda i: (0, 0)),           # b1 (resident)
                pl.BlockSpec((H, D_out), lambda i: (0, 0)),       # W2 (resident)
                pl.BlockSpec((1, D_out), lambda i: (0, 0)),       # b2 (resident)
                pl.BlockSpec((1, D_out), lambda i: (0, 0)),       # mask (resident)
            ],
            out_specs=pl.BlockSpec((tile_b, D_out), lambda i: (i, 0)),
        ),
        compiler_params=pltpu.CompilerParams(
            dimension_semantics=("parallel",),   # batch tiles are independent
        ),
    )(x, w1_t, b1_row, w2_t, b2_row, mask_row)


def masked_generator(x, w1, b1, w2, b2, mask, *, tile_b=2048, use_bf16=False):
    """Convenience wrapper.  For repeated calls, hoist prepare_params() yourself."""
    params = prepare_params(w1, b1, w2, b2, mask, use_bf16=use_bf16)
    return masked_generator_forward(x, params, tile_b=tile_b, use_bf16=use_bf16)


def reference(x, w1, b1, w2, b2, mask):
    h = jnp.maximum(x @ w1.T + b1, 0.0)
    return jnp.tanh(h @ w2.T + b2) * mask


if __name__ == "__main__":
    # Small shapes consistent with the module: Linear(100, 128) -> Linear(128, output_dim)
    batch = 8
    input_dim = 100
    hidden = 128
    output_dim = 16

    key = jax.random.PRNGKey(0)
    kx, kw1, kb1, kw2, kb2, km = jax.random.split(key, 6)

    x = jax.random.normal(kx, (batch, input_dim), dtype=jnp.float32)

    # PyTorch Linear stores weight as (out_features, in_features).
    w1 = jax.random.normal(kw1, (hidden, input_dim), dtype=jnp.float32) * 0.05
    b1 = jax.random.normal(kb1, (hidden,), dtype=jnp.float32) * 0.05
    w2 = jax.random.normal(kw2, (output_dim, hidden), dtype=jnp.float32) * 0.05
    b2 = jax.random.normal(kb2, (output_dim,), dtype=jnp.float32) * 0.05

    # Binary mask over output features (as in MaskedGenerator.__init__(mask=...));
    # the kernel applies the mask after tanh, so soft masks would also be exact.
    mask = (jax.random.uniform(km, (output_dim,)) > 0.5).astype(jnp.float32)

    ref = reference(x, w1, b1, w2, b2, mask)

    # f32 path (exact vs reference, used for the tight self-check).
    params_f32 = prepare_params(w1, b1, w2, b2, mask, use_bf16=False)
    out = masked_generator_forward(x, params_f32, use_bf16=False)
    out = jax.block_until_ready(out)
    assert out.shape == (batch, output_dim)
    assert jnp.allclose(out, ref, atol=1e-5, rtol=1e-5)

    # bf16 production path (half the HBM traffic); loose tolerance by design.
    params_bf16 = prepare_params(w1, b1, w2, b2, mask, use_bf16=True)
    out_bf16 = masked_generator_forward(x, params_bf16, use_bf16=True)
    out_bf16 = jax.block_until_ready(out_bf16)
    assert out_bf16.shape == (batch, output_dim)
    assert jnp.allclose(out_bf16.astype(jnp.float32), ref, atol=1e-1)

    print("KERNEL_OK")
</pallas_src>

<mosaic_0001>
module attributes {stable_mosaic.version = 11 : i64} {
  func.func @masked_generator_kernel(%arg0: i32, %arg1: memref<8x100xf32, #tpu.memory_space<vmem>>, %arg2: memref<100x128xf32, #tpu.memory_space<vmem>>, %arg3: memref<1x128xf32, #tpu.memory_space<vmem>>, %arg4: memref<128x16xf32, #tpu.memory_space<vmem>>, %arg5: memref<1x16xf32, #tpu.memory_space<vmem>>, %arg6: memref<1x16xf32, #tpu.memory_space<vmem>>, %arg7: memref<8x16xf32, #tpu.memory_space<vmem>>) attributes {dimension_semantics = [#tpu.dimension_semantics<parallel>], iteration_bounds = array<i64: 1>, scalar_prefetch = 0 : i64, scratch_operands = 0 : i64, tpu.core_type = #tpu.core_type<tc>, window_params = [{transform_indices = @transform_0, window_bounds = array<i64: 8, 100>}, {pipeline_mode = #tpu.pipeline_mode<synchronous>, transform_indices = @transform_1, window_bounds = array<i64: 100, 128>}, {pipeline_mode = #tpu.pipeline_mode<synchronous>, transform_indices = @transform_2, window_bounds = array<i64: 1, 128>}, {pipeline_mode = #tpu.pipeline_mode<synchronous>, transform_indices = @transform_3, window_bounds = array<i64: 128, 16>}, {pipeline_mode = #tpu.pipeline_mode<synchronous>, transform_indices = @transform_4, window_bounds = array<i64: 1, 16>}, {pipeline_mode = #tpu.pipeline_mode<synchronous>, transform_indices = @transform_5, window_bounds = array<i64: 1, 16>}, {transform_indices = @transform_6, window_bounds = array<i64: 8, 16>}]} {
    %c0 = arith.constant 0 : index
    %c0_0 = arith.constant 0 : index
    %0 = vector.load %arg1[%c0, %c0_0] : memref<8x100xf32, #tpu.memory_space<vmem>>, vector<8x100xf32>
    %c0_1 = arith.constant 0 : index
    %c0_2 = arith.constant 0 : index
    %1 = vector.load %arg2[%c0_1, %c0_2] : memref<100x128xf32, #tpu.memory_space<vmem>>, vector<100x128xf32>
    %cst = arith.constant dense<0.000000e+00> : vector<8x128xf32>
    %2 = tpu.matmul %0, %1, %cst {dimension_numbers = #tpu.dot_dimension_numbers<[1], [0], [0], [1], [0, 0, 1, 1], [], []>} : vector<8x100xf32>, vector<100x128xf32>, vector<8x128xf32> -> vector<8x128xf32>
    %c0_3 = arith.constant 0 : index
    %c0_4 = arith.constant 0 : index
    %3 = vector.load %arg3[%c0_3, %c0_4] : memref<1x128xf32, #tpu.memory_space<vmem>>, vector<1x128xf32>
    %4 = vector.broadcast %3 : vector<1x128xf32> to vector<8x128xf32>
    %5 = arith.addf %2, %4 : vector<8x128xf32>
    %cst_5 = arith.constant 0.000000e+00 : f32
    %6 = vector.broadcast %cst_5 : f32 to vector<8x128xf32>
    %7 = arith.maximumf %5, %6 : vector<8x128xf32>
    %c0_6 = arith.constant 0 : index
    %c0_7 = arith.constant 0 : index
    %8 = vector.load %arg4[%c0_6, %c0_7] : memref<128x16xf32, #tpu.memory_space<vmem>>, vector<128x16xf32>
    %cst_8 = arith.constant dense<0.000000e+00> : vector<8x16xf32>
    %9 = tpu.matmul %7, %8, %cst_8 {dimension_numbers = #tpu.dot_dimension_numbers<[1], [0], [0], [1], [0, 0, 1, 1], [], []>} : vector<8x128xf32>, vector<128x16xf32>, vector<8x16xf32> -> vector<8x16xf32>
    %c0_9 = arith.constant 0 : index
    %c0_10 = arith.constant 0 : index
    %10 = vector.load %arg5[%c0_9, %c0_10] : memref<1x16xf32, #tpu.memory_space<vmem>>, vector<1x16xf32>
    %11 = vector.broadcast %10 : vector<1x16xf32> to vector<8x16xf32>
    %12 = arith.addf %9, %11 : vector<8x16xf32>
    %13 = math.tanh %12 : vector<8x16xf32>
    %c0_11 = arith.constant 0 : index
    %c0_12 = arith.constant 0 : index
    %14 = vector.load %arg6[%c0_11, %c0_12] : memref<1x16xf32, #tpu.memory_space<vmem>>, vector<1x16xf32>
    %15 = vector.broadcast %14 : vector<1x16xf32> to vector<8x16xf32>
    %16 = arith.mulf %13, %15 : vector<8x16xf32>
    %c0_13 = arith.constant 0 : index
    %c0_14 = arith.constant 0 : index
    %17 = vector.load %arg7[%c0_13, %c0_14] : memref<8x16xf32, #tpu.memory_space<vmem>>, vector<8x16xf32>
    tpu.vector_store %arg7[%c0_13, %c0_14], %16 {strides = array<i32>} : memref<8x16xf32, #tpu.memory_space<vmem>>, vector<8x16xf32>,
    return
  }
  func.func @transform_0(%arg0: i32) -> (i32, i32) {
    %c0_i32 = arith.constant 0 : i32
    %c0_i32_0 = arith.constant 0 : i32
    return %arg0, %c0_i32 : i32, i32
  }
  func.func @transform_1(%arg0: i32) -> (i32, i32) {
    %c0_i32 = arith.constant 0 : i32
    %c0_i32_0 = arith.constant 0 : i32
    %c0_i32_1 = arith.constant 0 : i32
    return %c0_i32, %c0_i32_0 : i32, i32
  }
  func.func @transform_2(%arg0: i32) -> (i32, i32) {
    %c0_i32 = arith.constant 0 : i32
    %c0_i32_0 = arith.constant 0 : i32
    %c0_i32_1 = arith.constant 0 : i32
    return %c0_i32, %c0_i32_0 : i32, i32
  }
  func.func @transform_3(%arg0: i32) -> (i32, i32) {
    %c0_i32 = arith.constant 0 : i32
    %c0_i32_0 = arith.constant 0 : i32
    %c0_i32_1 = arith.constant 0 : i32
    return %c0_i32, %c0_i32_0 : i32, i32
  }
  func.func @transform_4(%arg0: i32) -> (i32, i32) {
    %c0_i32 = arith.constant 0 : i32
    %c0_i32_0 = arith.constant 0 : i32
    %c0_i32_1 = arith.constant 0 : i32
    return %c0_i32, %c0_i32_0 : i32, i32
  }
  func.func @transform_5(%arg0: i32) -> (i32, i32) {
    %c0_i32 = arith.constant 0 : i32
    %c0_i32_0 = arith.constant 0 : i32
    %c0_i32_1 = arith.constant 0 : i32
    return %c0_i32, %c0_i32_0 : i32, i32
  }
  func.func @transform_6(%arg0: i32) -> (i32, i32) {
    %c0_i32 = arith.constant 0 : i32
    %c0_i32_0 = arith.constant 0 : i32
    return %arg0, %c0_i32 : i32, i32
  }
}

</mosaic_0001>

<bundles_post_ra>
// kernel: tpu_custom_call.1
= control target key start
LH: loop header
LB: loop body
LE: loop exit
PB: predicated region body
PF: predicated region fallthrough
CT: control target
= control target key end

     0   :  { %vm49_vm0 = vcmask 1043456   ;;  %v369_v1 = vmov 0.0   ;;  %vm370_vm1 = vmmov 0   ;;  %s540_s0 = inlined_call_operand.vmem [shape: f32[8,100], index: 0, kind: input, shape index: {}]   ;;  %s541_s1 = inlined_call_operand.vmem [shape: f32[100,128], index: 1, kind: input, shape index: {}]   ;;  %s542_s2 = inlined_call_operand.vmem [shape: f32[1,128], index: 2, kind: input, shape index: {}]   ;;  %s543_s3 = inlined_call_operand.vmem [shape: f32[128,16], index: 3, kind: input, shape index: {}]   ;;  %s544_s4 = inlined_call_operand.vmem [shape: f32[1,16], index: 4, kind: input, shape index: {}]   ;;  %s545_s5 = inlined_call_operand.vmem [shape: f32[1,16], index: 5, kind: input, shape index: {}]   ;;  %s546_s6 = inlined_call_operand.hbm [shape: f32[8,16], index: 6, kind: output, shape index: {}]  }
   0x1   :  { %v37_v0 = vld [vmem:[%s541_s1 + $0x60] sm:$0xf]  ;;  %278 = vmatprep.subr.mxu0 %v369_v1  ;;  %v36_v2 = vld [vmem:[%s541_s1 + $0x58] sm:$0xff]  ;;  %307 = vmatprep.subr.mxu1 %v369_v1  ;;  %v35_v3 = vld [vmem:[%s541_s1 + $0x50] sm:$0xff] }
   0x2   :  { %279 = vmatpush3.msk.msra.mxu0 %vm49_vm0, %v37_v0  ;;  %304 = vmatprep.mubr.msk.f32.mxu0 %vm370_vm1, %v369_v1  ;;  %v139_v4 = vld [vmem:[%s543_s3 + $0x78] sm:$0xff]  ;;  %v34_v5 = vld [vmem:[%s541_s1 + $0x48] sm:$0xff]  ;;  %v138_v6 = vld [vmem:[%s543_s3 + $0x70] sm:$0xff] }
   0x3   :  { %280 = vmatprep.subr.mxu0 %v369_v1  ;;  %339 = vmatprep.mubr.msk.f32.mxu1 %vm370_vm1, %v369_v1  ;;  %v137_v7 = vld [vmem:[%s543_s3 + $0x68] sm:$0xff]  ;;  %v33_v8 = vld [vmem:[%s541_s1 + $0x40] sm:$0xff]  ;;  %v32_v10 = vld [vmem:[%s541_s1 + $0x38] sm:$0xff] }
   0x4   :  { %281 = vmatpush3.msra.mxu0 %v36_v2  ;;  %308 = vmatpush3.msra.mxu1 %v139_v4  ;;  %v136_v9 = vld [vmem:[%s543_s3 + $0x60] sm:$0xff] }
   0x5   :  { %282 = vmatprep.subr.mxu0 %v369_v1  ;;  %309 = vmatprep.subr.mxu1 %v369_v1 }
   0x6   :  { %283 = vmatpush3.msra.mxu0 %v35_v3  ;;  %310 = vmatpush3.msra.mxu1 %v138_v6 }
   0x7   :  { %284 = vmatprep.subr.mxu0 %v369_v1  ;;  %311 = vmatprep.subr.mxu1 %v369_v1 }
   0x8   :  { %285 = vmatpush3.msra.mxu0 %v34_v5  ;;  %312 = vmatpush3.msra.mxu1 %v137_v7 }
   0x9   :  { %286 = vmatprep.subr.mxu0 %v369_v1 }
   0xa   :  { %11 = vsyncpa [#allocation3], 0  ;;  %287 = vmatpush3.msra.mxu0 %v33_v8  ;;  %313 = vmatprep.subr.mxu1 %v369_v1  ;;  %v135_v11 = vld [vmem:[%s543_s3 + $0x58] sm:$0xff]  ;;  %v31_v12 = vld [vmem:[%s541_s1 + $0x30] sm:$0xff]  ;;  %vm45_vm2 = vcmask 818176   ;;  %s371_s12 = smov [#allocation2]  }
   0xb   :  { %288 = vmatprep.subr.mxu0 %v369_v1  ;;  %314 = vmatpush3.msra.mxu1 %v136_v9  ;;  %v134_v13 = vld [vmem:[%s543_s3 + $0x50] sm:$0xff]  ;;  %v30_v14 = vld [vmem:[%s541_s1 + $0x28] sm:$0xff]  ;;  %v29_v16 = vld [vmem:[%s541_s1 + $0x20] sm:$0xff]  ;;  %s234_s13 = sshll.u32 %s371_s12, 4  ;;  %vm226_vm3 = vcmask 130048   ;;  %s235_s13 = int_to_ptr.vmem [resolvable:$true] %s234_s13 }
   0xc   :  { %289 = vmatpush3.msra.mxu0 %v32_v10  ;;  %315 = vmatprep.subr.mxu1 %v369_v1  ;;  %v133_v15 = vld [vmem:[%s543_s3 + $0x48] sm:$0xff]  ;;  %v132_v17 = vld [vmem:[%s543_s3 + $0x40] sm:$0xff]  ;;  %v28_v18 = vld [vmem:[%s541_s1 + $0x18] sm:$0xff]  ;;  %p352_p1 = scmp.lt.s32.totalorder %s235_s13, %s235_s13 }
   0xd   :  { %290 = vmatprep.subr.mxu0 %v369_v1  ;;  %316 = vmatpush3.msra.mxu1 %v135_v11  ;;  %v131_v19 = vld [vmem:[%s543_s3 + $0x38] sm:$0xff]  ;;  %v27_v20 = vld [vmem:[%s541_s1 + $0x10] sm:$0xff]  ;;  %v26_v22 = vld [vmem:[%s541_s1 + $0x8] sm:$0xff] }
   0xe   :  { %291 = vmatpush3.msra.mxu0 %v31_v12  ;;  %317 = vmatprep.subr.mxu1 %v369_v1  ;;  %v130_v21 = vld [vmem:[%s543_s3 + $0x30] sm:$0xff]  ;;  %v129_v23 = vld [vmem:[%s543_s3 + $0x28] sm:$0xff]  ;;  %v25_v24 = vld [vmem:[%s541_s1] sm:$0xff] }
   0xf   :  { %292 = vmatprep.subr.mxu0 %v369_v1  ;;  %318 = vmatpush3.msra.mxu1 %v134_v13  ;;  %v24_v25 = vld [vmem:[%s540_s0] sm:$0xff]  ;;  %v127_v27 = vld [vmem:[%s543_s3 + $0x18] sm:$0xff]  ;;  %v126_v28 = vld [vmem:[%s543_s3 + $0x10] sm:$0xff] }
  0x10   :  { %293 = vmatpush3.msra.mxu0 %v30_v14  ;;  %319 = vmatprep.subr.mxu1 %v369_v1  ;;  %v128_v26 = vld [vmem:[%s543_s3 + $0x20] sm:$0xff]  ;;  %v125_v29 = vld [vmem:[%s543_s3 + $0x8] sm:$0xff] }
  0x11   :  { %294 = vmatprep.subr.mxu0 %v369_v1  ;;  %320 = vmatpush3.msra.mxu1 %v133_v15  ;;  %v124_v30 = vld [vmem:[%s543_s3] sm:$0xff] }
  0x12   :  { %295 = vmatpush3.msra.mxu0 %v29_v16  ;;  %321 = vmatprep.subr.mxu1 %v369_v1  ;;  %v242_v31 = vld [vmem:[%s542_s2] ss:$0 sm:$0xff]  ;;  %s347_s2 = scalar_lea.vmem %s235_s13, 128 }
  0x13   :  { %296 = vmatprep.subr.mxu0 %v369_v1  ;;  %322 = vmatpush3.msra.mxu1 %v132_v17  ;;  %v245_v36 = vld [vmem:[%s544_s4] ss:$0 sm:$0xff]  ;;  %p348_p0 = scmp.ne.s32.totalorder %s235_s13, %s347_s2  ;;  %p353_p2 = scmp.lt.s32.totalorder %s347_s2, %s347_s2 }
  0x14   :  { %297 = vmatpush3.msra.mxu0 %v28_v18  ;;  %323 = vmatprep.subr.mxu1 %v369_v1  ;;  %v246_v40 = vld [vmem:[%s545_s5] ss:$0 sm:$0xff] }
  0x15   :  { %298 = vmatprep.subr.mxu0 %v369_v1  ;;  %324 = vmatpush3.msra.mxu1 %v131_v19  ;;  %p354_p3 = por %p353_p2, %p352_p1 }
  0x16   :  { %299 = vmatpush3.msra.mxu0 %v27_v20  ;;  %325 = vmatprep.subr.mxu1 %v369_v1 }
  0x17   :  { %300 = vmatprep.subr.mxu0 %v369_v1  ;;  %326 = vmatpush3.msra.mxu1 %v130_v21  ;;  %p355_p4 = pnand %p354_p3, %p348_p0 }
  0x18   :  { %301 = vmatpush3.msra.mxu0 %v26_v22  ;;  %327 = vmatprep.subr.mxu1 %v369_v1 }
  0x19   :  { %302 = vmatprep.subr.mxu0 %v369_v1  ;;  %328 = vmatpush3.msra.mxu1 %v129_v23 }
  0x1a   :  { %303 = vmatpush3.msra.mxu0 %v25_v24  ;;  %329 = vmatprep.subr.mxu1 %v369_v1 }
  0x1b   :  { %305 = vmatmul.mubr.msk.f32.vlgmr.msra.gmra.mxu0 %vm45_vm2, %v24_v25  ;;  %330 = vmatpush3.msra.mxu1 %v128_v26 }
  0x1c   :  { %331 = vmatprep.subr.mxu1 %v369_v1 }
  0x1d   :  { %332 = vmatpush3.msra.mxu1 %v127_v27 }
  0x1e   :  { %333 = vmatprep.subr.mxu1 %v369_v1 }
  0x1f   :  { %334 = vmatpush3.msra.mxu1 %v126_v28 }
  0x20   :  { %335 = vmatprep.subr.mxu1 %v369_v1 }
  0x21   :  { %336 = vmatpush3.msra.mxu1 %v125_v29 }
  0x22   :  { %337 = vmatprep.subr.mxu1 %v369_v1 }
  0x23   :  { %338 = vmatpush3.msra.mxu1 %v124_v30 }
  0xdb   :  { %v119_v32 = vpop.f32.mrf.mxu0 }
  0xdc   :  { %v120_v33 = vadd.f32 %v242_v31, %v119_v32 }
  0xdd   :  { %v306_v34 = vpop.f32.mrf.mxu0 }
  0xde   :  { %v123_v35 = vmax.f32 %v120_v33, 0.0 }
  0xe0   :  { %340 = vmatmul.mubr.f32.vlgmr.msra.gmra.mxu1 %v123_v35 }
 0x1a0   :  { %v213_v37 = vpop.f32.mrf.mxu1 }
 0x1a1   :  { %v214_v38 = vadd.f32 %v245_v36, %v213_v37 }
 0x1a2   :  { %v341_v39 = vpop.f32.mrf.mxu1 }
 0x1a3   :  { %345 = vtanh.f32 %v214_v38 }
 0x1b0   :  { %v346_v41 = vpop.eup %345 }
 0x1b1   :  { %v225_v42 = vmul.f32 %v346_v41, %v246_v40 }
 0x1b3   :  { %227 = vst.msk [vmem:[#allocation2] sm:$0xff] %vm226_vm3, %v225_v42 }
 0x1b4   :  { %358 = shalt.err (!%p355_p4)
}
 0x1b5   :  { %237 = dma.vmem_to_hbm [thread:$0]  %s235_s13, 128, %s546_s6, [#allocation3]  }
 0x1b6   :  { %367 = dma.done.wait [#allocation3], 128  }
 0x1b7   :  { %368 = vsyncadd [#allocation3], 4294967168 }
 0x1b8   :  { %241 = vsyncpa [#allocation3], 1 }

</bundles_post_ra>
